<compile_context>
chip_gen: v7x
topology: tpu7x:2x2x1
jax: 0.10.0
libtpu: 0.0.40
codegen_flags: <defaults>
</compile_context>

<pallas_src>
import jax
import jax.numpy as jnp
from jax.experimental import pallas as pl
from jax.experimental.pallas import tpu as pltpu

ALPHA = 1.0
GAMMA = 2.0   # == 2 -> focal power implemented as a square
XENT = 0.1
# reduction = "mean" (module default)


def _round_up(x: int, m: int) -> int:
    return ((x + m - 1) // m) * m


def _focal_cosine_kernel(logits_ref, target_ref, out_ref):
    logits = logits_ref[...].astype(jnp.float32)        # (TN, C)
    target = target_ref[...]                            # (TN, 1) int32
    tn, c = logits.shape

    # logits[i, target[i]] via compare + select (no float one-hot materialized)
    lane = jax.lax.broadcasted_iota(jnp.int32, (tn, c), 1)
    picked = jnp.where(lane == target, logits, 0.0)
    dot = jnp.sum(picked, axis=1, keepdims=True)                    # (TN, 1)

    sumsq = jnp.sum(logits * logits, axis=1, keepdims=True)         # (TN, 1)
    norm = jnp.sqrt(sumsq)                                          # (TN, 1)

    # Per-row reciprocals (cheap: (TN, 1)); eps match the PyTorch ops:
    #   cosine_similarity eps = 1e-8, F.normalize eps = 1e-12
    inv_cos = 1.0 / jnp.maximum(norm, 1e-8)
    inv_nrm = 1.0 / jnp.maximum(norm, 1e-12)

    # cosine_embedding_loss with y = 1 and one-hot target (||one_hot|| == 1)
    cos_loss = 1.0 - dot * inv_cos                                  # (TN, 1)

    # cross_entropy(F.normalize(logits), target, reduction='none')
    normed = logits * inv_nrm                                       # (TN, C) VPU mul
    # |normed| <= 1 -> exp cannot overflow; no max-shift needed.
    lse = jnp.log(jnp.sum(jnp.exp(normed), axis=1, keepdims=True))  # (TN, 1)
    cent = lse - dot * inv_nrm                                      # (TN, 1)

    pt = jnp.exp(-cent)
    one_m_pt = 1.0 - pt
    focal = ALPHA * (one_m_pt * one_m_pt) * cent    # GAMMA == 2 -> square, no pow

    out_ref[...] = cos_loss + XENT * focal


def _choose_block_n(n: int, c: int, itemsize: int) -> int:
    """Batch tile keeping a double-buffered logits tile well inside the
    default scoped VMEM on v5e / v6e / v7x."""
    budget_bytes = 4 * 1024 * 1024                 # per logits buffer (x2 dbl-buf)
    rows = budget_bytes // max(c * itemsize, 1)
    rows = max(8, min(512, (rows // 8) * 8))
    return min(rows, _round_up(n, 8))


def focal_cosine_loss(logits: jax.Array, target: jax.Array) -> jax.Array:
    """logits: (N, C) float (f32 or bf16 on the wire), target: (N,) int -> scalar f32."""
    n, c = logits.shape
    tn = _choose_block_n(n, c, logits.dtype.itemsize)
    n_pad = _round_up(n, tn)

    if n_pad != n:
        logits = jnp.pad(logits, ((0, n_pad - n), (0, 0)))
        target = jnp.pad(target, (0, n_pad - n))
    target2d = target.astype(jnp.int32).reshape(n_pad, 1)

    per_row = pl.pallas_call(
        _focal_cosine_kernel,
        out_shape=jax.ShapeDtypeStruct((n_pad, 1), jnp.float32),
        grid=(n_pad // tn,),
        in_specs=[
            pl.BlockSpec((tn, c), lambda i: (i, 0)),
            pl.BlockSpec((tn, 1), lambda i: (i, 0)),
        ],
        out_specs=pl.BlockSpec((tn, 1), lambda i: (i, 0)),
        compiler_params=pltpu.CompilerParams(
            dimension_semantics=("parallel",),
            vmem_limit_bytes=32 * 1024 * 1024,
        ),
    )(logits, target2d)

    # reduction == 'mean': mean(cos) + xent*mean(focal) == mean(cos + xent*focal)
    return jnp.sum(per_row[:n, 0]) / n


def _reference(logits, target):
    """Pure-JAX reference mirroring the PyTorch forward."""
    logits = logits.astype(jnp.float32)
    n, c = logits.shape
    onehot = jax.nn.one_hot(target, c, dtype=jnp.float32)
    dot = jnp.sum(logits * onehot, axis=1)
    norm = jnp.sqrt(jnp.sum(logits * logits, axis=1))
    cos_loss = jnp.mean(1.0 - dot / jnp.maximum(norm, 1e-8))
    normed = logits / jnp.maximum(norm, 1e-12)[:, None]
    logp = jax.nn.log_softmax(normed, axis=1)
    cent = -jnp.sum(logp * onehot, axis=1)
    pt = jnp.exp(-cent)
    focal = jnp.mean(ALPHA * (1.0 - pt) ** GAMMA * cent)
    return cos_loss + XENT * focal


if __name__ == "__main__":
    key = jax.random.PRNGKey(0)
    k1, k2 = jax.random.split(key)
    N, C = 8, 32
    logits = jax.random.normal(k1, (N, C), dtype=jnp.float32)
    target = jax.random.randint(k2, (N,), 0, C, dtype=jnp.int32)

    loss = focal_cosine_loss(logits, target)
    jax.block_until_ready(loss)

    ref = _reference(logits, target)
    assert jnp.allclose(loss, ref, atol=1e-4, rtol=1e-4), (loss, ref)
    print("KERNEL_OK")
</pallas_src>

<mosaic_0001>
module attributes {stable_mosaic.version = 11 : i64} {
  func.func @_focal_cosine_kernel(%arg0: i32, %arg1: memref<8x32xf32, #tpu.memory_space<vmem>>, %arg2: memref<8x1xi32, #tpu.memory_space<vmem>>, %arg3: memref<8x1xf32, #tpu.memory_space<vmem>>) attributes {dimension_semantics = [#tpu.dimension_semantics<parallel>], iteration_bounds = array<i64: 1>, scalar_prefetch = 0 : i64, scratch_operands = 0 : i64, tpu.core_type = #tpu.core_type<tc>, window_params = [{transform_indices = @transform_0, window_bounds = array<i64: 8, 32>}, {transform_indices = @transform_1, window_bounds = array<i64: 8, 1>}, {transform_indices = @transform_2, window_bounds = array<i64: 8, 1>}]} {
    %c0 = arith.constant 0 : index
    %c0_0 = arith.constant 0 : index
    %0 = vector.load %arg1[%c0, %c0_0] : memref<8x32xf32, #tpu.memory_space<vmem>>, vector<8x32xf32>
    %c0_1 = arith.constant 0 : index
    %c0_2 = arith.constant 0 : index
    %1 = vector.load %arg2[%c0_1, %c0_2] : memref<8x1xi32, #tpu.memory_space<vmem>>, vector<8x1xi32>
    %2 = tpu.iota {dimensions = array<i32: 1>} : vector<8x32xi32>
    %3 = vector.broadcast %1 : vector<8x1xi32> to vector<8x32xi32>
    %4 = arith.cmpi eq, %2, %3 : vector<8x32xi32>
    %cst = arith.constant 0.000000e+00 : f32
    %5 = vector.broadcast %cst : f32 to vector<8x32xf32>
    %6 = arith.select %4, %0, %5 : vector<8x32xi1>, vector<8x32xf32>
    %cst_3 = arith.constant dense<0.000000e+00> : vector<8xf32>
    %7 = vector.multi_reduction <add>, %6, %cst_3 [1] : vector<8x32xf32> to vector<8xf32>
    %8 = vector.shape_cast %7 : vector<8xf32> to vector<8x1xf32>
    %9 = arith.mulf %0, %0 : vector<8x32xf32>
    %cst_4 = arith.constant dense<0.000000e+00> : vector<8xf32>
    %10 = vector.multi_reduction <add>, %9, %cst_4 [1] : vector<8x32xf32> to vector<8xf32>
    %11 = vector.shape_cast %10 : vector<8xf32> to vector<8x1xf32>
    %12 = math.sqrt %11 : vector<8x1xf32>
    %cst_5 = arith.constant 9.99999993E-9 : f32
    %13 = vector.broadcast %cst_5 : f32 to vector<8x1xf32>
    %14 = arith.maximumf %12, %13 : vector<8x1xf32>
    %cst_6 = arith.constant 1.000000e+00 : f32
    %15 = vector.broadcast %cst_6 : f32 to vector<8x1xf32>
    %16 = arith.divf %15, %14 : vector<8x1xf32>
    %cst_7 = arith.constant 9.99999996E-13 : f32
    %17 = vector.broadcast %cst_7 : f32 to vector<8x1xf32>
    %18 = arith.maximumf %12, %17 : vector<8x1xf32>
    %cst_8 = arith.constant 1.000000e+00 : f32
    %19 = vector.broadcast %cst_8 : f32 to vector<8x1xf32>
    %20 = arith.divf %19, %18 : vector<8x1xf32>
    %21 = arith.mulf %8, %16 : vector<8x1xf32>
    %cst_9 = arith.constant 1.000000e+00 : f32
    %22 = vector.broadcast %cst_9 : f32 to vector<8x1xf32>
    %23 = arith.subf %22, %21 : vector<8x1xf32>
    %24 = vector.broadcast %20 : vector<8x1xf32> to vector<8x32xf32>
    %25 = arith.mulf %0, %24 : vector<8x32xf32>
    %26 = math.exp %25 : vector<8x32xf32>
    %cst_10 = arith.constant dense<0.000000e+00> : vector<8xf32>
    %27 = vector.multi_reduction <add>, %26, %cst_10 [1] : vector<8x32xf32> to vector<8xf32>
    %28 = vector.shape_cast %27 : vector<8xf32> to vector<8x1xf32>
    %29 = math.log %28 : vector<8x1xf32>
    %30 = arith.mulf %8, %20 : vector<8x1xf32>
    %31 = arith.subf %29, %30 : vector<8x1xf32>
    %cst_11 = arith.constant 0.000000e+00 : f32
    %32 = vector.broadcast %cst_11 : f32 to vector<8x1xf32>
    %33 = arith.subf %32, %31 : vector<8x1xf32>
    %34 = math.exp %33 : vector<8x1xf32>
    %cst_12 = arith.constant 1.000000e+00 : f32
    %35 = vector.broadcast %cst_12 : f32 to vector<8x1xf32>
    %36 = arith.subf %35, %34 : vector<8x1xf32>
    %37 = arith.mulf %36, %36 : vector<8x1xf32>
    %cst_13 = arith.constant 1.000000e+00 : f32
    %38 = vector.broadcast %cst_13 : f32 to vector<8x1xf32>
    %39 = arith.mulf %38, %37 : vector<8x1xf32>
    %40 = arith.mulf %39, %31 : vector<8x1xf32>
    %cst_14 = arith.constant 1.000000e-01 : f32
    %41 = vector.broadcast %cst_14 : f32 to vector<8x1xf32>
    %42 = arith.mulf %41, %40 : vector<8x1xf32>
    %43 = arith.addf %23, %42 : vector<8x1xf32>
    %c0_15 = arith.constant 0 : index
    %c0_16 = arith.constant 0 : index
    %44 = vector.load %arg3[%c0_15, %c0_16] : memref<8x1xf32, #tpu.memory_space<vmem>>, vector<8x1xf32>
    tpu.vector_store %arg3[%c0_15, %c0_16], %43 {strides = array<i32>} : memref<8x1xf32, #tpu.memory_space<vmem>>, vector<8x1xf32>,
    return
  }
  func.func @transform_0(%arg0: i32) -> (i32, i32) {
    %c0_i32 = arith.constant 0 : i32
    %c0_i32_0 = arith.constant 0 : i32
    return %arg0, %c0_i32 : i32, i32
  }
  func.func @transform_1(%arg0: i32) -> (i32, i32) {
    %c0_i32 = arith.constant 0 : i32
    %c0_i32_0 = arith.constant 0 : i32
    return %arg0, %c0_i32 : i32, i32
  }
  func.func @transform_2(%arg0: i32) -> (i32, i32) {
    %c0_i32 = arith.constant 0 : i32
    %c0_i32_0 = arith.constant 0 : i32
    return %arg0, %c0_i32 : i32, i32
  }
}

</mosaic_0001>

<bundles_post_ra>
// kernel: tpu_custom_call.1
= control target key start
LH: loop header
LB: loop body
LE: loop exit
PB: predicated region body
PF: predicated region fallthrough
CT: control target
= control target key end

     0   :  { %vm20_vm0 = vcmask 261120   ;;  %v81_v1 = vmov 0   ;;  %v13_v15 = vlaneseq  ;;  %vm61_vm4 = vcmask 7168   ;;  %s109_s0 = inlined_call_operand.vmem [shape: f32[8,32], index: 0, kind: input, shape index: {}]   ;;  %s110_s1 = inlined_call_operand.vmem [shape: s32[8,1], index: 1, kind: input, shape index: {}]   ;;  %s111_s2 = inlined_call_operand.vmem [shape: f32[8,1], index: 2, kind: output, shape index: {}]  }
   0x1   :  { %v11_v0 = vld [vmem:[%s109_s0] sm:$0xff]  ;;  %68 = vset.pattern.permute.xlu0 %v81_v1 }
   0x2   :  { %v24_v2 = vmul.f32 %v11_v0, %v11_v0  ;;  %v12_v4 = vld [vmem:[%s110_s1] sm:$0xff]  ;;  %v14_v16 = vand.u32 127, %v13_v15 }
   0x4   :  { %v25_v3 = vsel %vm20_vm0, %v24_v2, 0.0 }
   0x5   :  { %26 = vadd.xlane.f32.xlu0 %v25_v3 }
  0x1b   :  { %16 = vperm.xlu0 %68, %v12_v4  }
  0x92   :  { %v27_v5 = vpop.xlane.xlu0 %26 }
  0x93   :  { %69 = vrsqrt.f32 %v27_v5  ;;  %vm30_vm1 = vcmp.eq.f32.partialorder %v27_v5, inf  ;;  %v33_v8 = vand.u32 2147483648, %v27_v5  ;;  %vm32_vm2 = vcmp.eq.f32.partialorder %v27_v5, 0.0 }
  0x9a   :  { %v17_v17 = vpop.permute.xlu0 %16 }
  0x9b   :  { %vm18_vm3 = vcmp.eq.s32.totalorder %v14_v16, %v17_v17 }
  0x9c   :  { %v19_v19 = vsel %vm18_vm3, %v11_v0, 0.0 }
  0x9d   :  { %v70_v6 = vpop.eup %69  ;;  %v21_v21 = vsel %vm20_vm0, %v19_v19, 0.0 }
  0x9e   :  { %v29_v7 = vmul.f32 %v70_v6, %v27_v5 }
  0xa0   :  { %v31_v9 = vsel %vm30_vm1, %v27_v5, %v29_v7 }
  0xa1   :  { %v34_v10 = vsel %vm32_vm2, %v33_v8, %v31_v9 }
  0xa2   :  { %v38_v11 = vmax.f32 %v34_v10, 1e-12  ;;  %v35_v29 = vmax.f32 %v34_v10, 1e-08 }
  0xa4   :  { %71 = vrcp.f32 %v38_v11 }
  0xae   :  { %v72_v12 = vpop.eup %71 }
  0xaf   :  { %v43_v13 = vmul.f32 %v72_v12, %v11_v0 }
  0xb1   :  { %v44_v14 = vmul.f32 1.442695, %v43_v13 }
  0xb3   :  { %73 = vpow2.f32 %v44_v14 }
  0xbd   :  { %v74_v18 = vpop.eup %73 }
  0xbe   :  { %v46_v20 = vsel %vm20_vm0, %v74_v18, 0.0 }
  0xbf   :  { %47 = vadd.xlane.f32.xlu1 %v46_v20 }
  0xc3   :  { %22 = vadd.xlane.f32.xlu1 %v21_v21 }
 0x14c   :  { %v48_v22 = vpop.xlane.xlu1 %47 }
 0x14d   :  { %75 = vlog2.f32 %v48_v22 }
 0x150   :  { %v23_v23 = vpop.xlane.xlu1 %22 }
 0x151   :  { %v51_v26 = vmul.f32 %v72_v12, %v23_v23 }
 0x157   :  { %v76_v24 = vpop.eup %75 }
 0x158   :  { %v50_v25 = vmul.f32 0.6931472, %v76_v24 }
 0x15a   :  { %v52_v27 = vsub.f32 %v50_v25, %v51_v26 }
 0x15c   :  { %v53_v28 = vsub.f32 0.0, %v52_v27 }
 0x15e   :  { %v54_v30 = vmul.f32 1.442695, %v53_v28 }
 0x160   :  { %77 = vpow2.f32 %v54_v30 }
 0x161   :  { %79 = vrcp.f32 %v35_v29 }
 0x16a   :  { %v78_v31 = vpop.eup %77 }
 0x16b   :  { %v56_v32 = vsub.f32 1.0, %v78_v31  ;;  %v80_v33 = vpop.eup %79 }
 0x16c   :  { %v41_v34 = vmul.f32 %v80_v33, %v23_v23 }
 0x16d   :  { %v57_v35 = vmul.f32 %v56_v32, %v56_v32 }
 0x16e   :  { %v42_v37 = vsub.f32 1.0, %v41_v34 }
 0x16f   :  { %v58_v36 = vmul.f32 %v57_v35, %v52_v27 }
 0x171   :  { %v59_v38 = vmul.f32 0.1, %v58_v36 }
 0x173   :  { %v60_v39 = vadd.f32 %v59_v38, %v42_v37 }
 0x175   :  { %62 = vst.msk [vmem:[%s111_s2] sm:$0xff] %vm61_vm4, %v60_v39 }

</bundles_post_ra>
